<compile_context>
chip_gen: v7x
topology: tpu7x:2x2x1
jax: 0.10.0
libtpu: 0.0.40
codegen_flags: <defaults>
</compile_context>

<pallas_src>
import jax
import jax.numpy as jnp
from jax.experimental import pallas as pl
from jax.experimental.pallas import tpu as pltpu


# ---------------- problem configuration (small, deterministic) ----------------
B = 2            # batch
C_IN = 4         # n_inputs
C_OUT = 8        # n_outputs  (!= C_IN -> downsample 1x1 conv exists)
L = 128          # seq_len (multiple of 128 -> lane-dense, unmasked stores)
K = 3            # kernel_size
DIL = 2          # dilation
PAD = (K - 1) * DIL      # padding = 4; with Chomp1d this is a causal left pad
BL = B * L               # flattened (batch * length) lane axis = 256
# NOTE: stride is fixed at 1 (the usual TCN setting); the kernel assumes it.


def _causal_taps(v):
    """v: (C, B*L). Returns (K*C, B*L).

    Tap k is v causally left-shifted by s = PAD - k*DIL along the lane axis,
    with the first s positions of EVERY batch segment zeroed (this reproduces
    both the conv's left zero-padding and prevents cross-batch leakage from
    the flattened layout / roll wrap-around)."""
    pos = jax.lax.broadcasted_iota(jnp.int32, v.shape, 1) % L
    taps = []
    for k in range(K):
        s = PAD - k * DIL                          # static shift
        if s > 0:
            t = pltpu.roll(v, shift=s, axis=1)     # XLU lane rotate (free slot)
            t = jnp.where(pos >= s, t, 0.0)        # zero wrapped / cross-batch cols
        else:
            t = v                                  # k = K-1 tap is v itself
        taps.append(t)
    return jnp.concatenate(taps, axis=0)


def temporal_block_kernel(x_ref, w1d_ref, b1d_ref, w2_ref, b2_ref, a_ref, o_ref):
    """Whole batch in one invocation (grid = ()).

    x_ref   : (B, C_IN, L)        input, native module layout
    w1d_ref : (2*C_OUT, K*C_IN)   [conv1 weight (tap-flat) ; downsample weight]
    b1d_ref : (2*C_OUT, 1)        [b1 ; bd]
    w2_ref  : (C_OUT, K*C_OUT)    conv2 weight, tap-flattened
    b2_ref  : (C_OUT, 1)
    a_ref   : (3,) SMEM           PReLU slopes (relu1, relu2, relu)
    o_ref   : (B, C_OUT, L)
    """
    # hoist the SMEM scalar reads once
    a1 = a_ref[0]
    a2 = a_ref[1]
    a3 = a_ref[2]

    # native (B, C_IN, L) -> lane-dense (C_IN, B*L); static per-batch slices
    x_flat = jnp.concatenate([x_ref[b] for b in range(B)], axis=1)

    # ---- conv1 + 1x1 downsample fused into ONE MXU matmul ----
    x_taps = _causal_taps(x_flat)                            # (K*C_IN, B*L)
    hr = jnp.dot(w1d_ref[...], x_taps,
                 preferred_element_type=jnp.float32) + b1d_ref[...]
    h_pre = hr[:C_OUT, :]                                    # conv1 pre-activation
    res = hr[C_OUT:, :]                                      # residual (downsample(x))
    h = jnp.where(h_pre > 0, h_pre, a1 * h_pre)              # PReLU #1
    # TODO(synk): nn.Dropout is identity at inference; no RNG masking here.

    # ---- conv2: taps of h built in registers, one MXU matmul ----
    h_taps = _causal_taps(h)                                 # (K*C_OUT, B*L)
    out = jnp.dot(w2_ref[...], h_taps,
                  preferred_element_type=jnp.float32) + b2_ref[...]
    out = jnp.where(out > 0, out, a2 * out)                  # PReLU #2

    s_all = out + res
    y = jnp.where(s_all > 0, s_all, a3 * s_all)              # final PReLU

    # lane-dense (C_OUT, B*L) -> (B, C_OUT, L): one full-width store per batch
    for b in range(B):
        o_ref[b] = y[:, b * L:(b + 1) * L]


def prepare_params(w1, b1, w2, b2, wd, bd):
    """One-time (parameter-load time) flattening/fusion; NOT on the hot path."""
    # tap-flattened weights: Wf[o, k*Ci + c] = w[o, c, k]
    w1_f = jnp.transpose(w1, (0, 2, 1)).reshape(C_OUT, K * C_IN)
    # downsample weight aligned to the unshifted (k = K-1) tap columns
    wd_pad = jnp.concatenate(
        [jnp.zeros((C_OUT, (K - 1) * C_IN), jnp.float32), wd], axis=1)
    w1d = jnp.concatenate([w1_f, wd_pad], axis=0)            # (2*C_OUT, K*C_IN)
    b1d = jnp.concatenate([b1, bd]).reshape(2 * C_OUT, 1)    # (2*C_OUT, 1)
    w2_f = jnp.transpose(w2, (0, 2, 1)).reshape(C_OUT, K * C_OUT)
    b2_c = b2.reshape(C_OUT, 1)
    return w1d, b1d, w2_f, b2_c


@jax.jit
def temporal_block(x, w1d, b1d, w2f, b2c, prelu_params):
    """x: (B, C_IN, L) f32 -> (B, C_OUT, L) f32.
    Hot path = exactly one pallas_call, no wrapper-side layout ops."""
    vmem = lambda: pl.BlockSpec(memory_space=pltpu.MemorySpace.VMEM)
    return pl.pallas_call(
        temporal_block_kernel,
        out_shape=jax.ShapeDtypeStruct((B, C_OUT, L), jnp.float32),
        in_specs=[vmem(),   # x (native layout)
                  vmem(),   # fused conv1+downsample weight
                  vmem(),   # fused bias
                  vmem(),   # conv2 weight
                  vmem(),   # conv2 bias
                  pl.BlockSpec(memory_space=pltpu.MemorySpace.SMEM)],  # prelu
        out_specs=vmem(),
    )(x, w1d, b1d, w2f, b2c, prelu_params)


# ----------------------------- reference (plain JAX) -----------------------------
def _causal_dconv_ref(x, w, b):
    """x: (B, Ci, L), w: (Co, Ci, K), b: (Co,) -> (B, Co, L)."""
    xp = jnp.pad(x, ((0, 0), (0, 0), (PAD, 0)))
    out = jnp.zeros((x.shape[0], w.shape[0], L), jnp.float32)
    for k in range(K):
        out = out + jnp.einsum('oi,bil->bol', w[:, :, k],
                               xp[:, :, k * DIL:k * DIL + L])
    return out + b[None, :, None]


def temporal_block_ref(x, w1, b1, w2, b2, wd, bd, a):
    prelu = lambda v, al: jnp.where(v > 0, v, al * v)
    h = prelu(_causal_dconv_ref(x, w1, b1), a[0])
    out = prelu(_causal_dconv_ref(h, w2, b2), a[1])
    res = jnp.einsum('oi,bil->bol', wd, x) + bd[None, :, None]
    return prelu(out + res, a[2])


# --------------------------------------- main ---------------------------------------
if __name__ == "__main__":
    key = jax.random.PRNGKey(0)
    kx, kv1, kb1, kv2, kb2, kvd, kbd = jax.random.split(key, 7)

    x = jax.random.normal(kx, (B, C_IN, L), jnp.float32)

    # weight_norm parametrization: weight = g * v / ||v|| (norm per out channel).
    # At init g = ||v||, matching nn.utils.weight_norm. Folded once here.
    v1 = 0.01 * jax.random.normal(kv1, (C_OUT, C_IN, K), jnp.float32)
    g1 = jnp.sqrt(jnp.sum(v1 * v1, axis=(1, 2), keepdims=True))
    w1 = g1 * v1 / jnp.sqrt(jnp.sum(v1 * v1, axis=(1, 2), keepdims=True))
    b1 = 0.1 * jax.random.normal(kb1, (C_OUT,), jnp.float32)

    v2 = 0.01 * jax.random.normal(kv2, (C_OUT, C_OUT, K), jnp.float32)
    g2 = jnp.sqrt(jnp.sum(v2 * v2, axis=(1, 2), keepdims=True))
    w2 = g2 * v2 / jnp.sqrt(jnp.sum(v2 * v2, axis=(1, 2), keepdims=True))
    b2 = 0.1 * jax.random.normal(kb2, (C_OUT,), jnp.float32)

    wd = 0.01 * jax.random.normal(kvd, (C_OUT, C_IN), jnp.float32)  # 1x1 conv
    bd = 0.1 * jax.random.normal(kbd, (C_OUT,), jnp.float32)

    # PReLU params (PyTorch default init = 0.25) for relu1, relu2, relu
    prelu_params = jnp.array([0.25, 0.25, 0.25], jnp.float32)

    # one-time parameter preparation (off the per-call hot path)
    w1d, b1d, w2f, b2c = prepare_params(w1, b1, w2, b2, wd, bd)

    y = temporal_block(x, w1d, b1d, w2f, b2c, prelu_params)
    y = jax.block_until_ready(y)

    y_ref = temporal_block_ref(x, w1, b1, w2, b2, wd, bd, prelu_params)
    assert y.shape == (B, C_OUT, L)
    assert jnp.max(jnp.abs(y - y_ref)) < 1e-5, "mismatch vs. reference"

    print("KERNEL_OK")
</pallas_src>

<mosaic_0001>
module attributes {stable_mosaic.version = 11 : i64} {
  func.func @temporal_block_kernel(%arg0: memref<2x4x128xf32, #tpu.memory_space<vmem>>, %arg1: memref<16x12xf32, #tpu.memory_space<vmem>>, %arg2: memref<16x1xf32, #tpu.memory_space<vmem>>, %arg3: memref<8x24xf32, #tpu.memory_space<vmem>>, %arg4: memref<8x1xf32, #tpu.memory_space<vmem>>, %arg5: memref<3xf32, #tpu.memory_space<smem>>, %arg6: memref<2x8x128xf32, #tpu.memory_space<vmem>>) attributes {dimension_semantics = [], scalar_prefetch = 0 : i64, scratch_operands = 0 : i64, tpu.core_type = #tpu.core_type<tc>} {
    %c0 = arith.constant 0 : index
    %0 = memref.load %arg5[%c0] : memref<3xf32, #tpu.memory_space<smem>>
    %c1 = arith.constant 1 : index
    %1 = memref.load %arg5[%c1] : memref<3xf32, #tpu.memory_space<smem>>
    %c2 = arith.constant 2 : index
    %2 = memref.load %arg5[%c2] : memref<3xf32, #tpu.memory_space<smem>>
    %c0_0 = arith.constant 0 : index
    %c0_1 = arith.constant 0 : index
    %c0_2 = arith.constant 0 : index
    %3 = vector.load %arg0[%c0_0, %c0_1, %c0_2] : memref<2x4x128xf32, #tpu.memory_space<vmem>>, vector<1x4x128xf32>
    %4 = vector.shape_cast %3 : vector<1x4x128xf32> to vector<4x128xf32>
    %c1_3 = arith.constant 1 : index
    %c0_4 = arith.constant 0 : index
    %c0_5 = arith.constant 0 : index
    %5 = vector.load %arg0[%c1_3, %c0_4, %c0_5] : memref<2x4x128xf32, #tpu.memory_space<vmem>>, vector<1x4x128xf32>
    %6 = vector.shape_cast %5 : vector<1x4x128xf32> to vector<4x128xf32>
    %7 = tpu.concatenate %4, %6 in 1 : vector<4x128xf32>, vector<4x128xf32> -> vector<4x256xf32>
    %8 = tpu.iota {dimensions = array<i32: 1>} : vector<4x256xi32>
    %c128_i32 = arith.constant 128 : i32
    %c0_i32 = arith.constant 0 : i32
    %9 = arith.cmpi eq, %c128_i32, %c0_i32 : i32
    %c1_i32 = arith.constant 1 : i32
    %10 = arith.select %9, %c1_i32, %c128_i32 : i32
    %11 = vector.broadcast %10 : i32 to vector<4x256xi32>
    %12 = arith.remsi %8, %11 : vector<4x256xi32>
    %c0_i32_6 = arith.constant 0 : i32
    %13 = vector.broadcast %c0_i32_6 : i32 to vector<4x256xi32>
    %14 = arith.cmpi ne, %12, %13 : vector<4x256xi32>
    %c0_i32_7 = arith.constant 0 : i32
    %15 = vector.broadcast %c0_i32_7 : i32 to vector<4x256xi32>
    %16 = arith.cmpi slt, %12, %15 : vector<4x256xi32>
    %c0_i32_8 = arith.constant 0 : i32
    %17 = arith.cmpi slt, %10, %c0_i32_8 : i32
    %18 = vector.broadcast %17 : i1 to vector<4x256xi1>
    %19 = vector.broadcast %18 : vector<4x256xi1> to vector<4x256xi1>
    %20 = arith.xori %16, %19 : vector<4x256xi1>
    %21 = arith.andi %20, %14 : vector<4x256xi1>
    %22 = vector.broadcast %10 : i32 to vector<4x256xi32>
    %23 = arith.addi %12, %22 : vector<4x256xi32>
    %24 = arith.select %21, %23, %12 : vector<4x256xi1>, vector<4x256xi32>
    %c4_i32 = arith.constant 4 : i32
    %25 = tpu.dynamic_rotate %7 by %c4_i32 dim 1 : vector<4x256xf32>, i32 -> vector<4x256xf32>
    %c4_i32_9 = arith.constant 4 : i32
    %26 = vector.broadcast %c4_i32_9 : i32 to vector<4x256xi32>
    %27 = arith.cmpi sge, %24, %26 : vector<4x256xi32>
    %cst = arith.constant 0.000000e+00 : f32
    %28 = vector.broadcast %cst : f32 to vector<4x256xf32>
    %29 = arith.select %27, %25, %28 : vector<4x256xi1>, vector<4x256xf32>
    %c2_i32 = arith.constant 2 : i32
    %30 = tpu.dynamic_rotate %7 by %c2_i32 dim 1 : vector<4x256xf32>, i32 -> vector<4x256xf32>
    %c2_i32_10 = arith.constant 2 : i32
    %31 = vector.broadcast %c2_i32_10 : i32 to vector<4x256xi32>
    %32 = arith.cmpi sge, %24, %31 : vector<4x256xi32>
    %cst_11 = arith.constant 0.000000e+00 : f32
    %33 = vector.broadcast %cst_11 : f32 to vector<4x256xf32>
    %34 = arith.select %32, %30, %33 : vector<4x256xi1>, vector<4x256xf32>
    %35 = tpu.concatenate %29, %34, %7 in 0 : vector<4x256xf32>, vector<4x256xf32>, vector<4x256xf32> -> vector<12x256xf32>
    %c0_12 = arith.constant 0 : index
    %c0_13 = arith.constant 0 : index
    %36 = vector.load %arg1[%c0_12, %c0_13] : memref<16x12xf32, #tpu.memory_space<vmem>>, vector<16x12xf32>
    %cst_14 = arith.constant dense<0.000000e+00> : vector<16x256xf32>
    %37 = tpu.matmul %36, %35, %cst_14 {dimension_numbers = #tpu.dot_dimension_numbers<[1], [0], [0], [1], [0, 0, 1, 1], [], []>} : vector<16x12xf32>, vector<12x256xf32>, vector<16x256xf32> -> vector<16x256xf32>
    %c0_15 = arith.constant 0 : index
    %c0_16 = arith.constant 0 : index
    %38 = vector.load %arg2[%c0_15, %c0_16] : memref<16x1xf32, #tpu.memory_space<vmem>>, vector<16x1xf32>
    %39 = vector.broadcast %38 : vector<16x1xf32> to vector<16x256xf32>
    %40 = arith.addf %37, %39 : vector<16x256xf32>
    %41 = vector.extract_strided_slice %40 {offsets = [0, 0], sizes = [8, 256], strides = [1, 1]} : vector<16x256xf32> to vector<8x256xf32>
    %42 = vector.extract_strided_slice %40 {offsets = [8, 0], sizes = [8, 256], strides = [1, 1]} : vector<16x256xf32> to vector<8x256xf32>
    %cst_17 = arith.constant 0.000000e+00 : f32
    %43 = vector.broadcast %cst_17 : f32 to vector<8x256xf32>
    %44 = arith.cmpf ogt, %41, %43 : vector<8x256xf32>
    %45 = vector.broadcast %0 : f32 to vector<8x256xf32>
    %46 = arith.mulf %45, %41 : vector<8x256xf32>
    %47 = arith.select %44, %41, %46 : vector<8x256xi1>, vector<8x256xf32>
    %48 = tpu.iota {dimensions = array<i32: 1>} : vector<8x256xi32>
    %c128_i32_18 = arith.constant 128 : i32
    %c0_i32_19 = arith.constant 0 : i32
    %49 = arith.cmpi eq, %c128_i32_18, %c0_i32_19 : i32
    %c1_i32_20 = arith.constant 1 : i32
    %50 = arith.select %49, %c1_i32_20, %c128_i32_18 : i32
    %51 = vector.broadcast %50 : i32 to vector<8x256xi32>
    %52 = arith.remsi %48, %51 : vector<8x256xi32>
    %c0_i32_21 = arith.constant 0 : i32
    %53 = vector.broadcast %c0_i32_21 : i32 to vector<8x256xi32>
    %54 = arith.cmpi ne, %52, %53 : vector<8x256xi32>
    %c0_i32_22 = arith.constant 0 : i32
    %55 = vector.broadcast %c0_i32_22 : i32 to vector<8x256xi32>
    %56 = arith.cmpi slt, %52, %55 : vector<8x256xi32>
    %c0_i32_23 = arith.constant 0 : i32
    %57 = arith.cmpi slt, %50, %c0_i32_23 : i32
    %58 = vector.broadcast %57 : i1 to vector<8x256xi1>
    %59 = vector.broadcast %58 : vector<8x256xi1> to vector<8x256xi1>
    %60 = arith.xori %56, %59 : vector<8x256xi1>
    %61 = arith.andi %60, %54 : vector<8x256xi1>
    %62 = vector.broadcast %50 : i32 to vector<8x256xi32>
    %63 = arith.addi %52, %62 : vector<8x256xi32>
    %64 = arith.select %61, %63, %52 : vector<8x256xi1>, vector<8x256xi32>
    %c4_i32_24 = arith.constant 4 : i32
    %65 = tpu.dynamic_rotate %47 by %c4_i32_24 dim 1 : vector<8x256xf32>, i32 -> vector<8x256xf32>
    %c4_i32_25 = arith.constant 4 : i32
    %66 = vector.broadcast %c4_i32_25 : i32 to vector<8x256xi32>
    %67 = arith.cmpi sge, %64, %66 : vector<8x256xi32>
    %cst_26 = arith.constant 0.000000e+00 : f32
    %68 = vector.broadcast %cst_26 : f32 to vector<8x256xf32>
    %69 = arith.select %67, %65, %68 : vector<8x256xi1>, vector<8x256xf32>
    %c2_i32_27 = arith.constant 2 : i32
    %70 = tpu.dynamic_rotate %47 by %c2_i32_27 dim 1 : vector<8x256xf32>, i32 -> vector<8x256xf32>
    %c2_i32_28 = arith.constant 2 : i32
    %71 = vector.broadcast %c2_i32_28 : i32 to vector<8x256xi32>
    %72 = arith.cmpi sge, %64, %71 : vector<8x256xi32>
    %cst_29 = arith.constant 0.000000e+00 : f32
    %73 = vector.broadcast %cst_29 : f32 to vector<8x256xf32>
    %74 = arith.select %72, %70, %73 : vector<8x256xi1>, vector<8x256xf32>
    %75 = tpu.concatenate %69, %74, %47 in 0 : vector<8x256xf32>, vector<8x256xf32>, vector<8x256xf32> -> vector<24x256xf32>
    %c0_30 = arith.constant 0 : index
    %c0_31 = arith.constant 0 : index
    %76 = vector.load %arg3[%c0_30, %c0_31] : memref<8x24xf32, #tpu.memory_space<vmem>>, vector<8x24xf32>
    %cst_32 = arith.constant dense<0.000000e+00> : vector<8x256xf32>
    %77 = tpu.matmul %76, %75, %cst_32 {dimension_numbers = #tpu.dot_dimension_numbers<[1], [0], [0], [1], [0, 0, 1, 1], [], []>} : vector<8x24xf32>, vector<24x256xf32>, vector<8x256xf32> -> vector<8x256xf32>
    %c0_33 = arith.constant 0 : index
    %c0_34 = arith.constant 0 : index
    %78 = vector.load %arg4[%c0_33, %c0_34] : memref<8x1xf32, #tpu.memory_space<vmem>>, vector<8x1xf32>
    %79 = vector.broadcast %78 : vector<8x1xf32> to vector<8x256xf32>
    %80 = arith.addf %77, %79 : vector<8x256xf32>
    %cst_35 = arith.constant 0.000000e+00 : f32
    %81 = vector.broadcast %cst_35 : f32 to vector<8x256xf32>
    %82 = arith.cmpf ogt, %80, %81 : vector<8x256xf32>
    %83 = vector.broadcast %1 : f32 to vector<8x256xf32>
    %84 = arith.mulf %83, %80 : vector<8x256xf32>
    %85 = arith.select %82, %80, %84 : vector<8x256xi1>, vector<8x256xf32>
    %86 = arith.addf %85, %42 : vector<8x256xf32>
    %cst_36 = arith.constant 0.000000e+00 : f32
    %87 = vector.broadcast %cst_36 : f32 to vector<8x256xf32>
    %88 = arith.cmpf ogt, %86, %87 : vector<8x256xf32>
    %89 = vector.broadcast %2 : f32 to vector<8x256xf32>
    %90 = arith.mulf %89, %86 : vector<8x256xf32>
    %91 = arith.select %88, %86, %90 : vector<8x256xi1>, vector<8x256xf32>
    %92 = vector.extract_strided_slice %91 {offsets = [0, 0], sizes = [8, 128], strides = [1, 1]} : vector<8x256xf32> to vector<8x128xf32>
    %c0_37 = arith.constant 0 : index
    %c0_38 = arith.constant 0 : index
    %c0_39 = arith.constant 0 : index
    %93 = vector.load %arg6[%c0_37, %c0_38, %c0_39] : memref<2x8x128xf32, #tpu.memory_space<vmem>>, vector<1x8x128xf32>
    %94 = vector.shape_cast %93 : vector<1x8x128xf32> to vector<8x128xf32>
    %95 = vector.shape_cast %92 : vector<8x128xf32> to vector<1x8x128xf32>
    tpu.vector_store %arg6[%c0_37, %c0_38, %c0_39], %95 {strides = array<i32>} : memref<2x8x128xf32, #tpu.memory_space<vmem>>, vector<1x8x128xf32>,
    %96 = vector.extract_strided_slice %91 {offsets = [0, 128], sizes = [8, 128], strides = [1, 1]} : vector<8x256xf32> to vector<8x128xf32>
    %c1_40 = arith.constant 1 : index
    %c0_41 = arith.constant 0 : index
    %c0_42 = arith.constant 0 : index
    %97 = vector.load %arg6[%c1_40, %c0_41, %c0_42] : memref<2x8x128xf32, #tpu.memory_space<vmem>>, vector<1x8x128xf32>
    %98 = vector.shape_cast %97 : vector<1x8x128xf32> to vector<8x128xf32>
    %99 = vector.shape_cast %96 : vector<8x128xf32> to vector<1x8x128xf32>
    tpu.vector_store %arg6[%c1_40, %c0_41, %c0_42], %99 {strides = array<i32>} : memref<2x8x128xf32, #tpu.memory_space<vmem>>, vector<1x8x128xf32>,
    return
  }
}

</mosaic_0001>

<bundles_post_ra>
// kernel: temporal_block.1
= control target key start
LH: loop header
LB: loop body
LE: loop exit
PB: predicated region body
PF: predicated region fallthrough
CT: control target
= control target key end

     0   :  { %11 = vsyncpa [#allocation4], 0  ;;  %s575_s0 = inlined_call_operand.vmem [shape: f32[2,4,128], index: 0, kind: input, shape index: {}]   ;;  %s576_s1 = inlined_call_operand.vmem [shape: f32[16,12], index: 1, kind: input, shape index: {}]   ;;  %s577_s2 = inlined_call_operand.vmem [shape: f32[16,1], index: 2, kind: input, shape index: {}]   ;;  %s578_s3 = inlined_call_operand.vmem [shape: f32[8,24], index: 3, kind: input, shape index: {}]   ;;  %s579_s4 = inlined_call_operand.vmem [shape: f32[8,1], index: 4, kind: input, shape index: {}]   ;;  %s580_s5 = inlined_call_operand.vmem [shape: f32[3], index: 5, kind: input, shape index: {}]   ;;  %s581_s6 = inlined_call_operand.hbm [shape: f32[2,8,128], index: 6, kind: output, shape index: {}]  }
   0x1   :  { %12 = vsyncpa [#allocation3], 0  ;;  %s29_s23 = sshll.u32 %s580_s5, 4  ;;  %s30_s23 = int_to_ptr.vmem [resolvable:$true] %s29_s23 }
   0x2   :  { %s401_s24 = scalar_lea.vmem %s30_s23, 16  ;;  %p406_p1 = scmp.lt.s32.totalorder %s30_s23, %s30_s23 }
   0x3   :  { %p402_p0 = scmp.ne.s32.totalorder %s30_s23, %s401_s24  ;;  %p407_p2 = scmp.lt.s32.totalorder %s401_s24, %s401_s24 }
   0x5   :  { %p408_p3 = por %p407_p2, %p406_p1 }
   0x7   :  { %p409_p4 = pnand %p408_p3, %p402_p0 }
   0x9   :  { %412 = shalt.err (!%p409_p4)
}
   0xa   :  { %s439_s25 = smov [#allocation2]  }
   0xb   :  { %32 = dma.vmem_to_smem %s30_s23, 16, %s439_s25, [#allocation4]  }
   0xc   :  { %435 = dma.done.wait [#allocation4], 16  }
   0xd   :  { %436 = vsyncadd [#allocation4], 4294967280 }
   0xe   :  { %36 = sfence }
   0xf   :  { %v40_v0 = vld [vmem:[%s575_s0] sm:$0xf]  ;;  %v348_v1 = vld [vmem:[%s575_s0 + $0x4] sm:$0xf]  ;;  %s440_s5 = smov 2   ;;  %v441_v3 = vmov 0.0   ;;  %v43_v6 = vlaneseq }
  0x10   :  { %v379_v2 = vpack.i.bf16 %v348_v1, %v40_v0  ;;  %192 = vmatprep.mubr.f32.mxu0 %v441_v3  ;;  %303 = vmatprep.mubr.f32.mxu1 %v441_v3  ;;  %v103_v4 = vld [vmem:[%s577_s2] sm:$0xff]  ;;  %v442_v5 = vmov 0   ;;  %s443_s8 = smov 4   ;;  %vm98_vm6 = vcmask 1043456   ;;  %vm444_vm7 = vmmov 1   ;;  %s37_s10 = sld [smem:[#allocation2]] }
  0x11   :  { %389 = vset.pattern.permute.xlu1 %v442_v5  ;;  %400 = vset.pattern.permute.xlu0 %v442_v5  ;;  %v497_v7 = vand.u32 127, %v43_v6  ;;  %vm359_vm8 = vmpackc.low %vm98_vm6, %vm444_vm7  ;;  %v101_v32 = vld [vmem:[%s576_s1] sm:$0xff]  ;;  %vm115_vm9 = vcmask 97280   ;;  %v102_v44 = vld [vmem:[%s576_s1 + $0x8] sm:$0xff]  ;;  %vm235_vm14 = vcmask 195584   ;;  %s347_s17 = sld [smem:[#allocation2 + $0x2]] }
  0x12   :  { %380 = vrot.lane.b32.xlu0 %v379_v2, %s440_s5  ;;  %107 = vperm.xlu1 %389, %v103_v4   ;;  %v229_v45 = vld [vmem:[%s579_s4] sm:$0xff]  ;;  %v104_v46 = vld [vmem:[%s577_s2 + $0x8] sm:$0xff]  ;;  %s346_s4 = sld [smem:[#allocation2 + $0x1]] }
  0x13   :  { %v45_v8 = vadd.s32 128, %v497_v7  ;;  %vm85_vm0 = vcmp.lt.s32.totalorder %v497_v7, 2  ;;  %vm88_vm1 = vcmp.ge.s32.totalorder %v497_v7, 2  ;;  %vm74_vm3 = vcmp.lt.s32.totalorder %v497_v7, 4  ;;  %v228_v59 = vld [vmem:[%s578_s3] sm:$0xff]  ;;  %s445_s3 = smov [#allocation5]  }
  0x14   :  { %vm77_vm5 = vcmp.ge.s32.totalorder %v497_v7, 4  ;;  %s334_s18 = sshll.u32 %s445_s3, 4  ;;  %s335_s18 = int_to_ptr.vmem [resolvable:$true] %s334_s18 }
  0x15   :  { %v57_v9 = vand.u32 127, %v45_v8  ;;  %vm368_vm13 = vmpackc.low %vm88_vm1, %vm77_vm5  ;;  %s413_s19 = scalar_lea.vmem %s335_s18, 256  ;;  %p418_p6 = scmp.lt.s32.totalorder %s335_s18, %s335_s18 }
  0x16   :  { %385 = vrot.lane.b32.xlu0 %v379_v2, %s443_s8  ;;  %v207_v35 = vstv %s37_s10  ;;  %p414_p5 = scmp.ne.s32.totalorder %s335_s18, %s413_s19  ;;  %p419_p7 = scmp.lt.s32.totalorder %s413_s19, %s413_s19 }
  0x17   :  { %vm502_vm2 = vcmp.ge.s32.totalorder %v57_v9, 2  ;;  %vm515_vm4 = vcmp.ge.s32.totalorder %v57_v9, 4  ;;  %v321_v9 = vstv %s347_s17 }
  0x18   :  { %vm365_vm12 = vmpackc.low %vm502_vm2, %vm515_vm4  ;;  %p420_p8 = por %p419_p7, %p418_p6 }
  0x1a   :  { %p421_p9 = pnand %p420_p8, %p414_p5 }
  0x84   :  { %v381_v10 = vpop.permute.xlu0 %380 }
  0x85   :  { %v383_v11 = vunpack.i.h.bf16 %v381_v10  ;;  %v382_v12 = vunpack.i.l.bf16 %v381_v10 }
  0x87   :  { %v86_v14 = vsel %vm85_vm0, %v382_v12, %v383_v11  ;;  %v87_v15 = vsel %vm85_vm0, %v383_v11, %v382_v12 }
  0x88   :  { %v90_v16 = vsel %vm88_vm1, %v87_v15, 0.0  ;;  %v386_v17 = vpop.permute.xlu0 %385  ;;  %v91_v18 = vsel %vm502_vm2, %v86_v14, 0.0 }
  0x89   :  { %v388_v19 = vunpack.i.h.bf16 %v386_v17  ;;  %v387_v20 = vunpack.i.l.bf16 %v386_v17  ;;  %v94_v22 = vrot.slane %v90_v16, 4  ;;  %v95_v25 = vrot.slane %v91_v18, 4 }
  0x8b   :  { %v76_v23 = vsel %vm74_vm3, %v388_v19, %v387_v20  ;;  %v75_v24 = vsel %vm74_vm3, %v387_v20, %v388_v19 }
  0x8c   :  { %v80_v26 = vsel %vm515_vm4, %v75_v24, 0.0  ;;  %v79_v27 = vsel %vm77_vm5, %v76_v23, 0.0 }
  0x8d   :  { %v100_v28 = vsel %vm98_vm6, %v80_v26, %v95_v25  ;;  %v99_v29 = vsel %vm98_vm6, %v79_v27, %v94_v22 }
  0x8e   :  { %v358_v30 = vpack.c.bf16 %v348_v1, %v100_v28  ;;  %v361_v31 = vpack.c.bf16 %v40_v0, %v99_v29  ;;  %v312_v1 = vstv %s346_s4 }
  0x90   :  { %360 = vmatprep.subr.msk.bf16.mxu0 %vm359_vm8, %v358_v30 }
  0x91   :  { %363 = vmatpush1.bf16.msk.msra.mxu0 %vm359_vm8, %v361_v31  ;;  %v108_v33 = vpop.permute.xlu1 %107 }
  0x94   :  { %351 = vmatmul.mubr.msk.f32.vlgmr.msra.gmra.mrb[0].mxu0 %vm115_vm9, %v101_v32 }
  0x95   :  { %198 = vmatprep.mubr.f32.mxu0 %v441_v3 }
  0x98   :  { %352 = vmatmul.mubr.msk.f32.gmra.mrb[2].mxu0 %vm115_vm9, %v102_v44 }
 0x167   :  { %v194_v34 = vpop.f32.mrb[0].mxu0 }
 0x168   :  { %v195_v36 = vadd.f32 %v194_v34, %v108_v33  ;;  %v196_v37 = vpop.f32.mrb[1].mxu0 }
 0x169   :  { %v197_v38 = vadd.f32 %v196_v37, %v108_v33 }
 0x16a   :  { %vm205_vm10 = vcmp.gt.f32.partialorder %v195_v36, 0.0  ;;  %v208_v39 = vmul.f32 %v207_v35, %v195_v36 }
 0x16b   :  { %vm206_vm11 = vcmp.gt.f32.partialorder %v197_v38, 0.0  ;;  %v209_v40 = vmul.f32 %v207_v35, %v197_v38  ;;  %v200_v60 = vpop.f32.mrb[2].mxu0 }
 0x16c   :  { %v210_v41 = vsel %vm205_vm10, %v195_v36, %v208_v39  ;;  %v202_v61 = vpop.f32.mrb[3].mxu0 }
 0x16d   :  { %v211_v42 = vsel %vm206_vm11, %v197_v38, %v209_v40 }
 0x16e   :  { %v395_v43 = vpack.i.bf16 %v211_v42, %v210_v41 }
 0x170   :  { %396 = vrot.lane.b32.xlu0 %v395_v43, %s440_s5  ;;  %391 = vrot.lane.b32.xlu1 %v395_v43, %s443_s8 }
 0x174   :  { %232 = vperm.xlu1 %389, %v229_v45   ;;  %112 = vperm.xlu0 %400, %v104_v46  }
 0x1e2   :  { %v397_v47 = vpop.permute.xlu0 %396  ;;  %v392_v48 = vpop.permute.xlu1 %391 }
 0x1e3   :  { %v399_v49 = vunpack.i.h.bf16 %v397_v47  ;;  %v398_v50 = vunpack.i.l.bf16 %v397_v47  ;;  %v394_v51 = vunpack.i.h.bf16 %v392_v48  ;;  %v393_v52 = vunpack.i.l.bf16 %v392_v48 }
 0x1e5   :  { %v216_v53 = vsel %vm74_vm3, %v393_v52, %v394_v51  ;;  %v224_v54 = vsel %vm85_vm0, %v398_v50, %v399_v49  ;;  %v217_v55 = vsel %vm74_vm3, %v394_v51, %v393_v52  ;;  %v225_v56 = vsel %vm85_vm0, %v399_v49, %v398_v50 }
 0x1e6   :  { %v364_v57 = vpack.c.bf16 %v224_v54, %v216_v53  ;;  %v367_v58 = vpack.c.bf16 %v225_v56, %v217_v55 }
 0x1e8   :  { %366 = vmatprep.subr.msk.bf16.mxu1 %vm365_vm12, %v364_v57 }
 0x1e9   :  { %369 = vmatpush1.bf16.msk.msra.mxu1 %vm368_vm13, %v367_v58 }
 0x1ea   :  { %243 = vmatprep.subr.mxu1 %v211_v42 }
 0x1ed   :  { %244 = vmatpush1.msra.mxu1 %v210_v41 }
 0x1ee   :  { %357 = vmatmul.mubr.msk.f32.vlgmr.msra.gmra.mrb[0].mxu1 %vm235_vm14, %v228_v59 }
 0x1f3   :  { %v113_v62 = vpop.permute.xlu0 %112  ;;  %v233_v63 = vpop.permute.xlu1 %232 }
 0x1f4   :  { %v201_v5 = vadd.f32 %v200_v60, %v113_v62  ;;  %v203_v7 = vadd.f32 %v202_v61, %v113_v62 }
 0x2c1   :  { %v305_v0 = vpop.f32.mrb[0].mxu1 }
 0x2c2   :  { %v306_v2 = vadd.f32 %v305_v0, %v233_v63  ;;  %v307_v3 = vpop.f32.mrb[1].mxu1 }
 0x2c3   :  { %v308_v4 = vadd.f32 %v307_v3, %v233_v63 }
 0x2c4   :  { %vm310_vm15 = vcmp.gt.f32.partialorder %v306_v2, 0.0  ;;  %v313_v6 = vmul.f32 %v312_v1, %v306_v2 }
 0x2c5   :  { %vm311_vm0 = vcmp.gt.f32.partialorder %v308_v4, 0.0  ;;  %v314_v8 = vmul.f32 %v312_v1, %v308_v4 }
 0x2c6   :  { %v315_v10 = vsel %vm310_vm15, %v306_v2, %v313_v6 }
 0x2c7   :  { %v316_v11 = vsel %vm311_vm0, %v308_v4, %v314_v8  ;;  %v317_v12 = vadd.f32 %v315_v10, %v201_v5 }
 0x2c8   :  { %v318_v13 = vadd.f32 %v316_v11, %v203_v7 }
 0x2c9   :  { %vm319_vm1 = vcmp.gt.f32.partialorder %v317_v12, 0.0  ;;  %v322_v14 = vmul.f32 %v321_v9, %v317_v12 }
 0x2ca   :  { %vm320_vm2 = vcmp.gt.f32.partialorder %v318_v13, 0.0  ;;  %v323_v15 = vmul.f32 %v321_v9, %v318_v13 }
 0x2cb   :  { %v324_v16 = vsel %vm319_vm1, %v317_v12, %v322_v14 }
 0x2cc   :  { %v325_v17 = vsel %vm320_vm2, %v318_v13, %v323_v15  ;;  %326 = vst [vmem:[#allocation5] sm:$0xff] %v324_v16 }
 0x2cd   :  { %328 = vst [vmem:[#allocation5 + $0x8] sm:$0xff] %v325_v17 }
 0x2ce   :  { %424 = shalt.err (!%p421_p9)
}
 0x2cf   :  { %s425_s22 = scalar_lea.hbm %s581_s6, 256 }
 0x2d0   :  { %p426_p10 = scmp.ne.s32.totalorder %s581_s6, %s425_s22  ;;  %p429_p11 = scmp.lt.u32.totalorder %s425_s22, %s581_s6 }
 0x2d2   :  { %p431_p12 = pnand %p429_p11, %p426_p10 }
 0x2d4   :  { %434 = shalt.err (!%p431_p12)
}
 0x2d5   :  { %s446_s27 = smov 128   ;;  %s447_s28 = smov 8  }
 0x2d6   :  { %340 = dma.vmem_to_hbm [thread:$0]  %s335_s18, 256, %s581_s6, [#allocation3], %s446_s27, %s446_s27, %s447_s28  }
 0x2d7   :  { %437 = dma.done.wait [#allocation3], 256  }
 0x2d8   :  { %438 = vsyncadd [#allocation3], 4294967040 }
 0x2d9   :  { %344 = vsyncpa [#allocation3], 1 }
 0x2da   :  { %345 = vsyncpa [#allocation4], 1 }

</bundles_post_ra>
